<compile_context>
chip_gen: v7x
topology: tpu7x:2x2x1
jax: 0.10.0
libtpu: 0.0.40
codegen_flags: <defaults>
</compile_context>

<pallas_src>
import functools

import jax
import jax.numpy as jnp
from jax.experimental import pallas as pl
from jax.experimental.pallas import tpu as pltpu


def _round_up(x, m):
    return ((x + m - 1) // m) * m


def _pool_max(x, n_seq, f):
    """Max over the sequence axis of a (tb, n_seq*f) flattened block.

    Each slice x[:, n*f:(n+1)*f] is a lane-aligned column group (when f is a
    multiple of 128), so this is a chain of plain VPU maximum ops — no
    cross-sublane (XLU) reduction.
    """
    acc = x[:, 0:f]
    for n in range(1, n_seq):
        acc = jnp.maximum(acc, x[:, n * f:(n + 1) * f])
    return acc


def critic_kernel(ev_ref, st_ref, w1_ref, b1_ref, w2_ref, b2_ref,
                  w3_ref, b3_ref, out_ref, *, n_event, n_strategy, fe, fs):
    # --- max pooling over the sequence dim (torch.max(., dim=1).values) ---
    # Max in the native (possibly bf16) dtype — order-preserving — then upcast.
    ev = _pool_max(ev_ref[...], n_event, fe).astype(jnp.float32)       # (tb, Fe)
    st = _pool_max(st_ref[...], n_strategy, fs).astype(jnp.float32)    # (tb, Fs)

    # --- state_feat = concat(event, strategy); layout-only when Fe % 128 == 0
    x = jnp.concatenate([ev, st], axis=-1)                              # (tb, D)

    # --- layer 1: single full-K matmul (fills the 256-deep MXU on v6e/v7x)
    h = jnp.dot(x, w1_ref[...], preferred_element_type=jnp.float32)
    h = jnp.maximum(h + b1_ref[...], 0.0)                               # (tb, D)

    # --- layer 2 + residual add + relu (residual uses x, no lane slices)
    h2 = jnp.dot(h, w2_ref[...], preferred_element_type=jnp.float32)
    h2 = jnp.maximum(x + h2 + b2_ref[...], 0.0)                         # (tb, D)

    # --- final D -> 1 projection: VPU multiply + lane reduction (not MXU N=1)
    v = jnp.sum(h2 * w3_ref[...], axis=-1, keepdims=True)               # (tb, 1)
    out_ref[...] = v + b3_ref[...]


def critic_net(event_feat, strategy_feat, params, *,
               tile_b_max=512, vmem_budget_bytes=40 << 20):
    """Pallas-backed CriticNet forward. Returns (B,) state values (f32)."""
    w1, b1, w2, b2, w3, b3 = params
    B, Ne, Fe = event_feat.shape
    _, Ns, Fs = strategy_feat.shape
    D = Fe + Fs
    assert w1.shape == (D, D) and w2.shape == (D, D) and w3.shape[0] == D

    # Flatten the sequence dim into lanes: free reshape (same HBM bytes),
    # keeps the in-kernel pooling off the sublane/XLU path.
    ev2 = event_feat.reshape(B, Ne * Fe)
    st2 = strategy_feat.reshape(B, Ns * Fs)

    b1 = b1.reshape(1, D).astype(jnp.float32)
    b2 = b2.reshape(1, D).astype(jnp.float32)
    w3r = w3.reshape(1, D).astype(jnp.float32)
    b3 = b3.reshape(1, 1).astype(jnp.float32)
    w1 = w1.astype(jnp.float32)
    w2 = w2.astype(jnp.float32)

    # ----- adaptive batch tile ------------------------------------------------
    feat_bytes = jnp.dtype(event_feat.dtype).itemsize
    # per batch-row VMEM cost: double-buffered feature tiles + f32 intermediates
    row_bytes = 2 * (Ne * Fe + Ns * Fs) * feat_bytes + 6 * D * 4
    # resident weights/biases (pessimistically assume 2 buffers each)
    resident = 2 * 4 * (2 * D * D + 3 * D + 1)
    avail = max(vmem_budget_bytes - resident, 64 * 1024)
    tb_vmem = max(8, (avail // row_bytes) // 8 * 8)

    # keep the grid >= 2 (ideally 4) steps so pipelining / megacore are used
    b_pad8 = _round_up(B, 8)
    if B >= 32:
        target_steps = 4
    elif B >= 16:
        target_steps = 2
    else:
        target_steps = 1
    tb_steps = max(8, _round_up(-(-b_pad8 // target_steps), 8))

    tb = max(8, min(tile_b_max, tb_vmem, tb_steps, b_pad8))
    b_pad = _round_up(B, tb)
    grid = (b_pad // tb,)

    if b_pad != B:
        # Padded rows flow through pooling/matmuls with zeros and are sliced
        # off at the end; real rows match the reference exactly.
        ev2 = jnp.pad(ev2, ((0, b_pad - B), (0, 0)))
        st2 = jnp.pad(st2, ((0, b_pad - B), (0, 0)))

    est_footprint = tb * row_bytes + resident + 2 * tb * 4
    vmem_limit = int(min(max(est_footprint + (4 << 20), 16 << 20), 48 << 20))

    flops = b_pad * (4 * D * D + 2 * D)
    bytes_accessed = int(b_pad * (Ne * Fe + Ns * Fs) * feat_bytes
                         + 4 * (2 * D * D + 3 * D + 1) + 4 * b_pad)

    kernel = functools.partial(critic_kernel, n_event=Ne, n_strategy=Ns,
                               fe=Fe, fs=Fs)

    out = pl.pallas_call(
        kernel,
        out_shape=jax.ShapeDtypeStruct((b_pad, 1), jnp.float32),
        grid=grid,
        in_specs=[
            # pipelined batch tiles (flattened features)
            pl.BlockSpec((tb, Ne * Fe), lambda i: (i, 0)),
            pl.BlockSpec((tb, Ns * Fs), lambda i: (i, 0)),
            # weights / biases: constant block index -> VMEM-resident
            pl.BlockSpec((D, D), lambda i: (0, 0)),
            pl.BlockSpec((1, D), lambda i: (0, 0)),
            pl.BlockSpec((D, D), lambda i: (0, 0)),
            pl.BlockSpec((1, D), lambda i: (0, 0)),
            pl.BlockSpec((1, D), lambda i: (0, 0)),
            pl.BlockSpec((1, 1), lambda i: (0, 0)),
        ],
        out_specs=pl.BlockSpec((tb, 1), lambda i: (i, 0)),
        compiler_params=pltpu.CompilerParams(
            dimension_semantics=("parallel",),
            vmem_limit_bytes=vmem_limit),
        cost_estimate=pl.CostEstimate(
            flops=flops, transcendentals=0, bytes_accessed=bytes_accessed),
    )(ev2, st2, w1, b1, w2, b2, w3r, b3)
    return out[:B, 0]                                        # .squeeze(-1)


def init_params(key, state_feature_size):
    """Deterministic parameter init for ResNetBlock(D, 1), batch_norm=False."""
    D = state_feature_size
    k1, k2, k3 = jax.random.split(key, 3)
    s = 1.0 / jnp.sqrt(D)
    w1 = jax.random.normal(k1, (D, D), jnp.float32) * s
    b1 = jnp.zeros((1, D), jnp.float32)
    w2 = jax.random.normal(k2, (D, D), jnp.float32) * s
    b2 = jnp.zeros((1, D), jnp.float32)
    w3 = jax.random.normal(k3, (D, 1), jnp.float32) * s
    b3 = jnp.zeros((1, 1), jnp.float32)
    return (w1, b1, w2, b2, w3, b3)


def critic_net_reference(event_feat, strategy_feat, params):
    """Pure-JAX reference mirroring the PyTorch forward."""
    w1, b1, w2, b2, w3, b3 = params
    ev = jnp.max(event_feat.astype(jnp.float32), axis=1)
    st = jnp.max(strategy_feat.astype(jnp.float32), axis=1)
    x = jnp.concatenate([ev, st], axis=-1)
    h = jnp.maximum(x @ w1 + b1.reshape(1, -1), 0.0)
    h = jnp.maximum(x + (h @ w2 + b2.reshape(1, -1)), 0.0)
    v = h @ w3 + b3.reshape(1, -1)
    return v[:, 0]


if __name__ == "__main__":
    # Small, deterministic example. B=61 exercises batch padding AND a
    # multi-step grid (tb=16 -> 4 pipelined steps / megacore-shardable).
    B, Ne, Ns = 61, 8, 8
    Fe, Fs = 128, 128
    state_feature_size = Fe + Fs               # 256

    key = jax.random.PRNGKey(0)
    k_ev, k_st, k_p = jax.random.split(key, 3)
    event_f32 = jax.random.normal(k_ev, (B, Ne, Fe), jnp.float32)
    strategy_f32 = jax.random.normal(k_st, (B, Ns, Fs), jnp.float32)
    # Simulate upstream producing bf16 features (halves feature HBM reads in
    # the kernel); both kernel and reference consume the same bf16 values.
    event_feat = event_f32.astype(jnp.bfloat16)
    strategy_feat = strategy_f32.astype(jnp.bfloat16)
    params = init_params(k_p, state_feature_size)

    out = critic_net(event_feat, strategy_feat, params)
    out = jax.block_until_ready(out)

    ref = critic_net_reference(event_feat, strategy_feat, params)
    assert out.shape == (B,)
    assert jnp.allclose(out, ref, atol=2e-2, rtol=2e-2), (out, ref)

    print("KERNEL_OK")
</pallas_src>

<mosaic_0001>
module attributes {stable_mosaic.version = 11 : i64} {
  func.func @critic_kernel(%arg0: i32, %arg1: memref<16x1024xbf16, #tpu.memory_space<vmem>>, %arg2: memref<16x1024xbf16, #tpu.memory_space<vmem>>, %arg3: memref<256x256xf32, #tpu.memory_space<vmem>>, %arg4: memref<1x256xf32, #tpu.memory_space<vmem>>, %arg5: memref<256x256xf32, #tpu.memory_space<vmem>>, %arg6: memref<1x256xf32, #tpu.memory_space<vmem>>, %arg7: memref<1x256xf32, #tpu.memory_space<vmem>>, %arg8: memref<1x1xf32, #tpu.memory_space<vmem>>, %arg9: memref<16x1xf32, #tpu.memory_space<vmem>>) attributes {dimension_semantics = [#tpu.dimension_semantics<parallel>], iteration_bounds = array<i64: 4>, scalar_prefetch = 0 : i64, scratch_operands = 0 : i64, tpu.core_type = #tpu.core_type<tc>, window_params = [{transform_indices = @transform_0, window_bounds = array<i64: 16, 1024>}, {transform_indices = @transform_1, window_bounds = array<i64: 16, 1024>}, {pipeline_mode = #tpu.pipeline_mode<synchronous>, transform_indices = @transform_2, window_bounds = array<i64: 256, 256>}, {pipeline_mode = #tpu.pipeline_mode<synchronous>, transform_indices = @transform_3, window_bounds = array<i64: 1, 256>}, {pipeline_mode = #tpu.pipeline_mode<synchronous>, transform_indices = @transform_4, window_bounds = array<i64: 256, 256>}, {pipeline_mode = #tpu.pipeline_mode<synchronous>, transform_indices = @transform_5, window_bounds = array<i64: 1, 256>}, {pipeline_mode = #tpu.pipeline_mode<synchronous>, transform_indices = @transform_6, window_bounds = array<i64: 1, 256>}, {pipeline_mode = #tpu.pipeline_mode<synchronous>, transform_indices = @transform_7, window_bounds = array<i64: 1, 1>}, {transform_indices = @transform_8, window_bounds = array<i64: 16, 1>}]} {
    %c0 = arith.constant 0 : index
    %c0_0 = arith.constant 0 : index
    %0 = vector.load %arg1[%c0, %c0_0] : memref<16x1024xbf16, #tpu.memory_space<vmem>>, vector<16x1024xbf16>
    %1 = vector.extract_strided_slice %0 {offsets = [0, 0], sizes = [16, 128], strides = [1, 1]} : vector<16x1024xbf16> to vector<16x128xbf16>
    %2 = vector.extract_strided_slice %0 {offsets = [0, 128], sizes = [16, 128], strides = [1, 1]} : vector<16x1024xbf16> to vector<16x128xbf16>
    %3 = arith.maximumf %1, %2 : vector<16x128xbf16>
    %4 = vector.extract_strided_slice %0 {offsets = [0, 256], sizes = [16, 128], strides = [1, 1]} : vector<16x1024xbf16> to vector<16x128xbf16>
    %5 = arith.maximumf %3, %4 : vector<16x128xbf16>
    %6 = vector.extract_strided_slice %0 {offsets = [0, 384], sizes = [16, 128], strides = [1, 1]} : vector<16x1024xbf16> to vector<16x128xbf16>
    %7 = arith.maximumf %5, %6 : vector<16x128xbf16>
    %8 = vector.extract_strided_slice %0 {offsets = [0, 512], sizes = [16, 128], strides = [1, 1]} : vector<16x1024xbf16> to vector<16x128xbf16>
    %9 = arith.maximumf %7, %8 : vector<16x128xbf16>
    %10 = vector.extract_strided_slice %0 {offsets = [0, 640], sizes = [16, 128], strides = [1, 1]} : vector<16x1024xbf16> to vector<16x128xbf16>
    %11 = arith.maximumf %9, %10 : vector<16x128xbf16>
    %12 = vector.extract_strided_slice %0 {offsets = [0, 768], sizes = [16, 128], strides = [1, 1]} : vector<16x1024xbf16> to vector<16x128xbf16>
    %13 = arith.maximumf %11, %12 : vector<16x128xbf16>
    %14 = vector.extract_strided_slice %0 {offsets = [0, 896], sizes = [16, 128], strides = [1, 1]} : vector<16x1024xbf16> to vector<16x128xbf16>
    %15 = arith.maximumf %13, %14 : vector<16x128xbf16>
    %16 = arith.extf %15 : vector<16x128xbf16> to vector<16x128xf32>
    %c0_1 = arith.constant 0 : index
    %c0_2 = arith.constant 0 : index
    %17 = vector.load %arg2[%c0_1, %c0_2] : memref<16x1024xbf16, #tpu.memory_space<vmem>>, vector<16x1024xbf16>
    %18 = vector.extract_strided_slice %17 {offsets = [0, 0], sizes = [16, 128], strides = [1, 1]} : vector<16x1024xbf16> to vector<16x128xbf16>
    %19 = vector.extract_strided_slice %17 {offsets = [0, 128], sizes = [16, 128], strides = [1, 1]} : vector<16x1024xbf16> to vector<16x128xbf16>
    %20 = arith.maximumf %18, %19 : vector<16x128xbf16>
    %21 = vector.extract_strided_slice %17 {offsets = [0, 256], sizes = [16, 128], strides = [1, 1]} : vector<16x1024xbf16> to vector<16x128xbf16>
    %22 = arith.maximumf %20, %21 : vector<16x128xbf16>
    %23 = vector.extract_strided_slice %17 {offsets = [0, 384], sizes = [16, 128], strides = [1, 1]} : vector<16x1024xbf16> to vector<16x128xbf16>
    %24 = arith.maximumf %22, %23 : vector<16x128xbf16>
    %25 = vector.extract_strided_slice %17 {offsets = [0, 512], sizes = [16, 128], strides = [1, 1]} : vector<16x1024xbf16> to vector<16x128xbf16>
    %26 = arith.maximumf %24, %25 : vector<16x128xbf16>
    %27 = vector.extract_strided_slice %17 {offsets = [0, 640], sizes = [16, 128], strides = [1, 1]} : vector<16x1024xbf16> to vector<16x128xbf16>
    %28 = arith.maximumf %26, %27 : vector<16x128xbf16>
    %29 = vector.extract_strided_slice %17 {offsets = [0, 768], sizes = [16, 128], strides = [1, 1]} : vector<16x1024xbf16> to vector<16x128xbf16>
    %30 = arith.maximumf %28, %29 : vector<16x128xbf16>
    %31 = vector.extract_strided_slice %17 {offsets = [0, 896], sizes = [16, 128], strides = [1, 1]} : vector<16x1024xbf16> to vector<16x128xbf16>
    %32 = arith.maximumf %30, %31 : vector<16x128xbf16>
    %33 = arith.extf %32 : vector<16x128xbf16> to vector<16x128xf32>
    %34 = tpu.concatenate %16, %33 in 1 : vector<16x128xf32>, vector<16x128xf32> -> vector<16x256xf32>
    %c0_3 = arith.constant 0 : index
    %c0_4 = arith.constant 0 : index
    %35 = vector.load %arg3[%c0_3, %c0_4] : memref<256x256xf32, #tpu.memory_space<vmem>>, vector<256x256xf32>
    %cst = arith.constant dense<0.000000e+00> : vector<16x256xf32>
    %36 = tpu.matmul %34, %35, %cst {dimension_numbers = #tpu.dot_dimension_numbers<[1], [0], [0], [1], [0, 0, 1, 1], [], []>} : vector<16x256xf32>, vector<256x256xf32>, vector<16x256xf32> -> vector<16x256xf32>
    %c0_5 = arith.constant 0 : index
    %c0_6 = arith.constant 0 : index
    %37 = vector.load %arg4[%c0_5, %c0_6] : memref<1x256xf32, #tpu.memory_space<vmem>>, vector<1x256xf32>
    %38 = vector.broadcast %37 : vector<1x256xf32> to vector<16x256xf32>
    %39 = arith.addf %36, %38 : vector<16x256xf32>
    %cst_7 = arith.constant 0.000000e+00 : f32
    %40 = vector.broadcast %cst_7 : f32 to vector<16x256xf32>
    %41 = arith.maximumf %39, %40 : vector<16x256xf32>
    %c0_8 = arith.constant 0 : index
    %c0_9 = arith.constant 0 : index
    %42 = vector.load %arg5[%c0_8, %c0_9] : memref<256x256xf32, #tpu.memory_space<vmem>>, vector<256x256xf32>
    %cst_10 = arith.constant dense<0.000000e+00> : vector<16x256xf32>
    %43 = tpu.matmul %41, %42, %cst_10 {dimension_numbers = #tpu.dot_dimension_numbers<[1], [0], [0], [1], [0, 0, 1, 1], [], []>} : vector<16x256xf32>, vector<256x256xf32>, vector<16x256xf32> -> vector<16x256xf32>
    %44 = arith.addf %34, %43 : vector<16x256xf32>
    %c0_11 = arith.constant 0 : index
    %c0_12 = arith.constant 0 : index
    %45 = vector.load %arg6[%c0_11, %c0_12] : memref<1x256xf32, #tpu.memory_space<vmem>>, vector<1x256xf32>
    %46 = vector.broadcast %45 : vector<1x256xf32> to vector<16x256xf32>
    %47 = arith.addf %44, %46 : vector<16x256xf32>
    %cst_13 = arith.constant 0.000000e+00 : f32
    %48 = vector.broadcast %cst_13 : f32 to vector<16x256xf32>
    %49 = arith.maximumf %47, %48 : vector<16x256xf32>
    %c0_14 = arith.constant 0 : index
    %c0_15 = arith.constant 0 : index
    %50 = vector.load %arg7[%c0_14, %c0_15] : memref<1x256xf32, #tpu.memory_space<vmem>>, vector<1x256xf32>
    %51 = vector.broadcast %50 : vector<1x256xf32> to vector<16x256xf32>
    %52 = arith.mulf %49, %51 : vector<16x256xf32>
    %cst_16 = arith.constant dense<0.000000e+00> : vector<16xf32>
    %53 = vector.multi_reduction <add>, %52, %cst_16 [1] : vector<16x256xf32> to vector<16xf32>
    %54 = vector.shape_cast %53 : vector<16xf32> to vector<16x1xf32>
    %c0_17 = arith.constant 0 : index
    %c0_18 = arith.constant 0 : index
    %55 = vector.load %arg8[%c0_17, %c0_18] : memref<1x1xf32, #tpu.memory_space<vmem>>, vector<1x1xf32>
    %56 = vector.broadcast %55 : vector<1x1xf32> to vector<16x1xf32>
    %57 = arith.addf %54, %56 : vector<16x1xf32>
    %c0_19 = arith.constant 0 : index
    %c0_20 = arith.constant 0 : index
    %58 = vector.load %arg9[%c0_19, %c0_20] : memref<16x1xf32, #tpu.memory_space<vmem>>, vector<16x1xf32>
    tpu.vector_store %arg9[%c0_19, %c0_20], %57 {strides = array<i32>} : memref<16x1xf32, #tpu.memory_space<vmem>>, vector<16x1xf32>,
    return
  }
  func.func @transform_0(%arg0: i32) -> (i32, i32) {
    %c0_i32 = arith.constant 0 : i32
    %c0_i32_0 = arith.constant 0 : i32
    return %arg0, %c0_i32 : i32, i32
  }
  func.func @transform_1(%arg0: i32) -> (i32, i32) {
    %c0_i32 = arith.constant 0 : i32
    %c0_i32_0 = arith.constant 0 : i32
    return %arg0, %c0_i32 : i32, i32
  }
  func.func @transform_2(%arg0: i32) -> (i32, i32) {
    %c0_i32 = arith.constant 0 : i32
    %c0_i32_0 = arith.constant 0 : i32
    %c0_i32_1 = arith.constant 0 : i32
    return %c0_i32, %c0_i32_0 : i32, i32
  }
  func.func @transform_3(%arg0: i32) -> (i32, i32) {
    %c0_i32 = arith.constant 0 : i32
    %c0_i32_0 = arith.constant 0 : i32
    %c0_i32_1 = arith.constant 0 : i32
    return %c0_i32, %c0_i32_0 : i32, i32
  }
  func.func @transform_4(%arg0: i32) -> (i32, i32) {
    %c0_i32 = arith.constant 0 : i32
    %c0_i32_0 = arith.constant 0 : i32
    %c0_i32_1 = arith.constant 0 : i32
    return %c0_i32, %c0_i32_0 : i32, i32
  }
  func.func @transform_5(%arg0: i32) -> (i32, i32) {
    %c0_i32 = arith.constant 0 : i32
    %c0_i32_0 = arith.constant 0 : i32
    %c0_i32_1 = arith.constant 0 : i32
    return %c0_i32, %c0_i32_0 : i32, i32
  }
  func.func @transform_6(%arg0: i32) -> (i32, i32) {
    %c0_i32 = arith.constant 0 : i32
    %c0_i32_0 = arith.constant 0 : i32
    %c0_i32_1 = arith.constant 0 : i32
    return %c0_i32, %c0_i32_0 : i32, i32
  }
  func.func @transform_7(%arg0: i32) -> (i32, i32) {
    %c0_i32 = arith.constant 0 : i32
    %c0_i32_0 = arith.constant 0 : i32
    %c0_i32_1 = arith.constant 0 : i32
    return %c0_i32, %c0_i32_0 : i32, i32
  }
  func.func @transform_8(%arg0: i32) -> (i32, i32) {
    %c0_i32 = arith.constant 0 : i32
    %c0_i32_0 = arith.constant 0 : i32
    return %arg0, %c0_i32 : i32, i32
  }
}

</mosaic_0001>

<bundles_post_ra>
// kernel: tpu_custom_call.1
= control target key start
LH: loop header
LB: loop body
LE: loop exit
PB: predicated region body
PF: predicated region fallthrough
CT: control target
= control target key end

     0   :  { %s1696_s0 = inlined_call_operand.hbm [shape: bf16[64,1024], index: 0, kind: input, shape index: {}]   ;;  %s1697_s1 = inlined_call_operand.hbm [shape: bf16[64,1024], index: 1, kind: input, shape index: {}]   ;;  %s1698_s2 = inlined_call_operand.hbm [shape: f32[256,256], index: 2, kind: input, shape index: {}]   ;;  %s1699_s3 = inlined_call_operand.vmem [shape: f32[1,256], index: 3, kind: input, shape index: {}]   ;;  %s1700_s4 = inlined_call_operand.hbm [shape: f32[256,256], index: 4, kind: input, shape index: {}]   ;;  %s1701_s5 = inlined_call_operand.vmem [shape: f32[1,256], index: 5, kind: input, shape index: {}]   ;;  %s1702_s6 = inlined_call_operand.vmem [shape: f32[1,256], index: 6, kind: input, shape index: {}]   ;;  %s1703_s7 = inlined_call_operand.<no memory space> [shape: f32[1,1], index: 7, kind: input, shape index: {}]   ;;  %s1704_s8 = inlined_call_operand.vmem [shape: f32[64,1], index: 8, kind: output, shape index: {}]  }
   0x1   :  { %1708 = sst [smem:[#allocation14_spill]] %s1696_s0  ;;  %v13_v0 = vstv %s1703_s7 }
   0x2   :  { %14 = vst [vmem:[#allocation2] sm:$0x1] %v13_v0 }
   0x3   :  { %15 = vsyncpa [#allocation4], 0 }
   0x4   :  { %17 = vsyncpa [#allocation4 + $0x1], 0 }
   0x5   :  { %18 = vsyncpa [#allocation6], 0 }
   0x6   :  { %20 = vsyncpa [#allocation6 + $0x1], 0 }
   0x7   :  { %21 = vsyncpa [#allocation9], 0  ;;  %s1408_s29 = smov 0   ;;  %s1410_s30 = smov 0  }
   0x8   :  { %s1412_s9 = smov 0   ;;  %s1414_s10 = smov 0  }
   0x9 LB: > { %s1427_s7 = sadd.s32 4294967295, %s1350_s10   ;;  %p47_p0 = scmp.ne.s32.totalorder %s1342_s30, %s1338_s29  ;;  %s1350_s10 = sphi %s1414_s10, %s1723_s10   ;;  %s1346_s9 = sphi %s1412_s9, %s1722_s9   ;;  %s1342_s30 = sphi %s1410_s30, %s1721_s30   ;;  %s1338_s29 = sphi %s1408_s29, %s1720_s29  }
   0xa   : > { %p1705_p1 = scmp.eq.s32.totalorder %s1427_s7, 0  ;;  %p965_p2 = scmp.ge.s32.totalorder %s1350_s10, 1 }
   0xb   : > { %p236_p3 = scmp.lt.s32.totalorder %s1350_s10, 5  ;;  %s1352_s13 = smov [#allocation7]  }
   0xc   : > { %p1435_p4 = por %p1705_p1, %p47_p0  ;;  %s248_s14 = sshll.u32 %s1352_s13, 4  ;;  %s249_s14 = int_to_ptr.vmem [resolvable:$true] %s248_s14 }
   0xd   : > { %p1439_p5 = pnand %p965_p2, %p236_p3  ;;  %s1353_s16 = smov [#allocation8]  }
   0xe   : > { %s1709_s11 = scalar_select %p1435_p4, 1, 0 }
   0xf   : > { %s1710_s12 = scalar_select %p1439_p5, 1, 0 }
  0x10   : > { %p1131_p6 = pneg %p1439_p5  ;;  %s264_s17 = sshll.u32 %s1353_s16, 4  ;;  %s1451_s17 = int_to_ptr.vmem [resolvable:$true] %s264_s17 }
  0x11   : > { %s1188_s20 = scalar_lea.hbm %s1698_s2, 8192 }
  0x12   : > { %p1447_p7 = pnand %p1131_p6, %p1705_p1  ;;  %p1189_p8 = scmp.ne.s32.totalorder %s1698_s2, %s1188_s20 }
  0x13   : > { %p1195_p12 = scmp.lt.u32.totalorder %s1188_s20, %s1698_s2 }
  0x14   : > { %p1190_p9 = pneg %p1447_p7 }
  0x16   : > { %p1191_p10 = pnand %p1190_p9, %p1189_p8 }
  0x18   : > { %p1192_p11 = pneg %p1191_p10 }
  0x1a   : > { %p1197_p13 = pnand %p1195_p12, %p1192_p11 }
  0x1c   : > { %1200 = shalt.err (!%p1197_p13)
}
  0x1d   : > { %s1201_s25 = scalar_lea.vmem %s249_s14, 8192  ;;  %p1209_p6 = scmp.lt.s32.totalorder %s249_s14, %s249_s14 }
  0x1e   : > { %p1202_p0 = scmp.ne.s32.totalorder %s249_s14, %s1201_s25  ;;  %p1210_p1 = scmp.lt.s32.totalorder %s1201_s25, %s1201_s25 }
  0x20   : > { %p1204_p2 = pnand %p1202_p0, %p1190_p9  ;;  %p1211_p4 = por %p1210_p1, %p1209_p6 }
  0x22   : > { %p1205_p3 = pneg %p1204_p2 }
  0x24   : > { %p1212_p5 = pnand %p1211_p4, %p1205_p3 }
  0x26   : > { %1215 = shalt.err (!%p1212_p5)
}
  0x27   : > { %s1354_s26 = smov 256   ;;  %s1355_s27 = smov 16  }
  0x28   : > { %1134 = dma.hbm_to_vmem [thread:$0]  (!%p1447_p7), %s1698_s2, 8192, %s249_s14, [#allocation6], %s1354_s26, %s1354_s26, %s1355_s27  }
  0x29   : > { %s1216_s18 = scalar_lea.hbm %s1700_s4, 8192 }
  0x2a   : > { %p1217_p8 = scmp.ne.s32.totalorder %s1700_s4, %s1216_s18  ;;  %p1223_p5 = scmp.lt.u32.totalorder %s1216_s18, %s1700_s4 }
  0x2c   : > { %p1219_p1 = pnand %p1217_p8, %p1190_p9 }
  0x2e   : > { %p1220_p4 = pneg %p1219_p1 }
  0x30   : > { %p1225_p10 = pnand %p1223_p5, %p1220_p4 }
  0x32   : > { %1228 = shalt.err (!%p1225_p10)
}
  0x33   : > { %s1229_s14 = scalar_lea.vmem %s1451_s17, 8192  ;;  %p1237_p0 = scmp.lt.s32.totalorder %s1451_s17, %s1451_s17 }
  0x34   : > { %p1230_p11 = scmp.ne.s32.totalorder %s1451_s17, %s1229_s14  ;;  %p1238_p2 = scmp.lt.s32.totalorder %s1229_s14, %s1229_s14 }
  0x36   : > { %p1232_p12 = pnand %p1230_p11, %p1190_p9  ;;  %p1239_p3 = por %p1238_p2, %p1237_p0 }
  0x38   : > { %p1233_p13 = pneg %p1232_p12 }
  0x3a   : > { %p1240_p6 = pnand %p1239_p3, %p1233_p13 }
  0x3c   : > { %1243 = shalt.err (!%p1240_p6)
}
  0x3d   : > { %1137 = dma.hbm_to_vmem [thread:$0]  (!%p1447_p7), %s1700_s4, 8192, %s1451_s17, [#allocation9], %s1354_s26, %s1354_s26, %s1355_s27  }
  0x3e   : > { %s1501_s25 = sadd.s32 1, %s1350_s10   ;;  %s34_s15 = sadd.s32 1, %s1346_s9 }
  0x3f   : > { %s31_s28 = ssub.s32 %s1350_s10, %s1501_s25  ;;  %p41_p9 = scmp.ne.s32.totalorder %s1346_s9, %s1342_s30 }
  0x40   : > { %p32_p8 = scmp.eq.s32.totalorder %s31_s28, 0  ;;  %p42_p1 = scmp.eq.s32.totalorder %s1350_s10, 0 }
  0x41   : > { %p1147_p4 = scmp.lt.s32.totalorder %s1350_s10, 4  ;;  %s287_s29 = sand.u32 1, %s1346_s9  }
  0x42   : > { %s1512_s13 = scalar_select %p32_p8, %s1346_s9, %s34_s15  }
  0x43   : > { %p43_p5 = por %p42_p1, %p41_p9  ;;  %s1514_s16 = sshll.u32 %s287_s29, 6 }
  0x44   : > { %s988_s18 = sshll.u32 %s1350_s10, 10  ;;  %s1712_s0 = sld [smem:[#allocation14_spill]] }
  0x45   : > { %s291_s27 = scalar_lea.vmem [#allocation3], %s1514_s16  ;;  %p1525_p7 = pnand %p1147_p4, %p43_p5 }
  0x46   : > { %s299_s20 = sshll.u32 %s291_s27, 4  ;;  %s1531_s22 = scalar_lea.sflag [#allocation4], %s287_s29  ;;  %s1529_s20 = int_to_ptr.vmem [resolvable:$true] %s299_s20 }
  0x47   : > { %p1246_p11 = pneg %p1525_p7 }
  0x4a   : > { %s1522_s26 = scalar_lea.hbm %s1712_s0, %s988_s18  ;;  %s1249_s15 = scalar_lea.hbm %s1712_s0, 4096 }
  0x4b   : > { %s1244_s14 = scalar_lea.hbm %s1522_s26, 1024  ;;  %p1250_p0 = scmp.lt.u32.totalorder %s1522_s26, %s1712_s0 }
  0x4c   : > { %p1245_p10 = scmp.ne.s32.totalorder %s1522_s26, %s1244_s14  ;;  %p1251_p2 = scmp.lt.u32.totalorder %s1249_s15, %s1244_s14 }
  0x4d   : > { %p1253_p6 = scmp.lt.u32.totalorder %s1244_s14, %s1522_s26 }
  0x4e   : > { %p1247_p12 = pnand %p1246_p11, %p1245_p10  ;;  %p1252_p3 = por %p1251_p2, %p1250_p0 }
  0x50   : > { %p1248_p13 = pneg %p1247_p12  ;;  %p1254_p9 = por %p1253_p6, %p1252_p3 }
  0x52   : > { %p1255_p8 = pnand %p1254_p9, %p1248_p13 }
  0x54   : > { %1258 = shalt.err (!%p1255_p8)
}
  0x55   : > { %s1259_s29 = scalar_lea.vmem %s1529_s20, 1024  ;;  %s1356_s17 = smov [#allocation3]  }
  0x56   : > { %p1260_p1 = scmp.ne.s32.totalorder %s1529_s20, %s1259_s29  ;;  %s1264_s27 = sshll.u32 %s1356_s17, 4  ;;  %s1265_s27 = int_to_ptr.vmem [resolvable:$false] %s1264_s27 }
  0x57   : > { %s1266_s23 = scalar_lea.vmem %s1265_s27, 2048  ;;  %p1267_p10 = scmp.lt.s32.totalorder %s1529_s20, %s1265_s27 }
  0x58   : > { %p1262_p4 = pnand %p1260_p1, %p1246_p11  ;;  %p1268_p12 = scmp.lt.s32.totalorder %s1266_s23, %s1259_s29 }
  0x5a   : > { %p1263_p5 = pneg %p1262_p4  ;;  %p1269_p0 = por %p1268_p12, %p1267_p10 }
  0x5c   : > { %p1270_p2 = pnand %p1269_p0, %p1263_p5 }
  0x5e   : > { %1273 = shalt.err (!%p1270_p2)
}
  0x5f   : > { %s1357_s14 = smov 512   ;;  %s1358_s24 = smov 32  }
  0x60   : > { %1141 = dma.hbm_to_vmem [thread:$0]  (!%p1525_p7), %s1522_s26, 1024, %s1529_s20, %s1531_s22, %s1357_s14, %s1357_s14, %s1358_s24  }
  0x61   : > { %s1567_s19 = scalar_lea.hbm %s1697_s1, %s988_s18  ;;  %s313_s29 = scalar_lea.vmem [#allocation5], %s1514_s16 }
  0x62   : > { %s321_s17 = sshll.u32 %s313_s29, 4  ;;  %s309_s27 = sand.u32 1, %s1350_s10   ;;  %s1571_s17 = int_to_ptr.vmem [resolvable:$true] %s321_s17 }
  0x63   : > { %s1573_s23 = scalar_lea.sflag [#allocation6], %s309_s27  ;;  %s1274_s0 = scalar_lea.hbm %s1567_s19, 1024 }
  0x64   : > { %p1275_p13 = scmp.ne.s32.totalorder %s1567_s19, %s1274_s0  ;;  %s1279_s20 = scalar_lea.hbm %s1697_s1, 4096 }
  0x65   : > { %p1280_p9 = scmp.lt.u32.totalorder %s1567_s19, %s1697_s1  ;;  %p1281_p8 = scmp.lt.u32.totalorder %s1279_s20, %s1274_s0 }
  0x66   : > { %p1277_p3 = pnand %p1275_p13, %p1246_p11  ;;  %p1283_p4 = scmp.lt.u32.totalorder %s1274_s0, %s1567_s19 }
  0x67   : > { %p1282_p1 = por %p1281_p8, %p1280_p9 }
  0x68   : > { %p1278_p6 = pneg %p1277_p3 }
  0x69   : > { %p1284_p5 = por %p1283_p4, %p1282_p1 }
  0x6b   : > { %p1285_p10 = pnand %p1284_p5, %p1278_p6 }
  0x6d   : > { %1288 = shalt.err (!%p1285_p10)
}
  0x6e   : > { %s1289_s10 = scalar_lea.vmem %s1571_s17, 1024  ;;  %s1359_s16 = smov [#allocation5]  }
  0x6f   : > { %p1290_p12 = scmp.ne.s32.totalorder %s1571_s17, %s1289_s10  ;;  %s1294_s28 = sshll.u32 %s1359_s16, 4  ;;  %s1295_s28 = int_to_ptr.vmem [resolvable:$false] %s1294_s28 }
  0x70   : > { %s1296_s29 = scalar_lea.vmem %s1295_s28, 2048  ;;  %p1297_p13 = scmp.lt.s32.totalorder %s1571_s17, %s1295_s28 }
  0x71   : > { %p1292_p0 = pnand %p1290_p12, %p1246_p11  ;;  %p1298_p3 = scmp.lt.s32.totalorder %s1296_s29, %s1289_s10 }
  0x73   : > { %p1293_p2 = pneg %p1292_p0  ;;  %p1299_p9 = por %p1298_p3, %p1297_p13 }
  0x75   : > { %p1300_p8 = pnand %p1299_p9, %p1293_p2 }
  0x77   : > { %1303 = shalt.err (!%p1300_p8)
}
  0x78   : > { %1144 = dma.hbm_to_vmem [thread:$0]  (!%p1525_p7), %s1567_s19, 1024, %s1571_s17, %s1573_s23, %s1357_s14, %s1357_s14, %s1358_s24  }
  0x79   : > { %p1714_p11 = scmp.ne.s32.totalorder %s1710_s12, 0 }
  0x7a   : > { %s335_s0 = sand.u32 (!%p1714_p11), 1, %s1342_s30   ;;  %p1715_p6 = scmp.ne.s32.totalorder (!%p1714_p11), %s1709_s11, 0 }
  0x7b   : > { %333 = sbr.rel (%p1714_p11) target bundleno = 798 (0x31e), region = 52  ;;  %s978_s27 = sshll.u32 (!%p1714_p11), %s335_s0, 6 }
  0x7c   : > { %s336_s26 = scalar_lea.sflag (!%p1714_p11), [#allocation4], %s335_s0  ;;  %s1605_s18 = scalar_lea.vmem (!%p1714_p11), [#allocation3], %s978_s27 }
  0x82   : > { %1321 = dma.done.wait (%p1715_p6), %s336_s26, 1024  }
  0x83   : > { %1323 = vsyncadd (%p1715_p6), %s336_s26, 4294966272  ;;  %s344_s21 = sand.u32 1, %s1427_s7   ;;  %s1612_s14 = scalar_lea.vmem [#allocation5], %s978_s27 }
  0x84   : > { %s345_s20 = scalar_lea.sflag [#allocation6], %s344_s21 }
  0x85   : > { %1325 = dma.done.wait (%p1715_p6), %s345_s20, 1024  }
  0x86   : > { %1327 = vsyncadd (%p1715_p6), %s345_s20, 4294966272  ;;  %p1716_p7 = scmp.eq.s32.totalorder %s1427_s7, 0 }
  0x88   : > { %1329 = dma.done.wait (%p1716_p7), [#allocation6], 8192   ;;  %p1717_p1 = pmov %p1716_p7 }
  0x8a   : > { %1331 = vsyncadd (%p1717_p1), [#allocation6], 4294959104  ;;  %p1718_p4 = pmov %p1717_p1 }
  0x8b   : > { %p1719_p5 = pmov %p1717_p1 }
  0x8c   : > { %1333 = dma.done.wait (%p1718_p4), [#allocation9], 8192  }
  0x8d   : > { %1335 = vsyncadd (%p1719_p5), [#allocation9], 4294959104  ;;  %v499_v1 = vld [vmem:[#allocation7 + $0x8] sm:$0xff]  ;;  %v501_v2 = vld [vmem:[#allocation7 + $0x18] sm:$0xff]  ;;  %s982_s22 = sshll.u32 %s1427_s7, 1  ;;  %vm851_vm0 = vcmask 7168  }
  0x8e   : > { %v498_v3 = vld [vmem:[#allocation7] sm:$0xff]  ;;  %v991_v4 = vpack.c.bf16 %v501_v2, %v499_v1  ;;  %v500_v5 = vld [vmem:[#allocation7 + $0x10] sm:$0xff]  ;;  %v503_v6 = vld [vmem:[#allocation7 + $0x28] sm:$0xff]  ;;  %p397_p10 = scmp.lt.s32.totalorder %s982_s22, 7 }
  0x8f   : > { %v505_v7 = vld [vmem:[#allocation7 + $0x38] sm:$0xff]  ;;  %v993_v8 = vpack.c.bf16 %v500_v5, %v498_v3  ;;  %v502_v10 = vld [vmem:[#allocation7 + $0x20] sm:$0xff]  ;;  %v504_v11 = vld [vmem:[#allocation7 + $0x30] sm:$0xff] }
  0x90   : > { %v995_v9 = vpack.c.bf16 %v505_v7, %v503_v6  ;;  %v507_v12 = vld [vmem:[#allocation7 + $0x48] sm:$0xff]  ;;  %992 = vmatprep.subr.bf16.mxu0 %v991_v4  ;;  %v509_v13 = vld [vmem:[#allocation7 + $0x58] sm:$0xff]  ;;  %v997_v14 = vpack.c.bf16 %v504_v11, %v502_v10  ;;  %v506_v16 = vld [vmem:[#allocation7 + $0x40] sm:$0xff]  ;;  %s1725_s22 = smov (!%p397_p10, %s982_s22), 7 }
  0x91   : > { %994 = vmatpush1.bf16.msra.mxu0 %v993_v8  ;;  %v999_v15 = vpack.c.bf16 %v509_v13, %v507_v12  ;;  %v508_v17 = vld [vmem:[#allocation7 + $0x50] sm:$0xff]  ;;  %v511_v18 = vld [vmem:[#allocation7 + $0x68] sm:$0xff]  ;;  %v513_v19 = vld [vmem:[#allocation7 + $0x78] sm:$0xff]  ;;  %s983_s15 = sshll.u32 %s1725_s22, 3 }
  0x92   : > { %996 = vmatprep.subr.bf16.mxu0 %v995_v9  ;;  %v1001_v20 = vpack.c.bf16 %v508_v17, %v506_v16  ;;  %v1003_v21 = vpack.c.bf16 %v513_v19, %v511_v18  ;;  %v510_v22 = vld [vmem:[#allocation7 + $0x60] sm:$0xff]  ;;  %v512_v23 = vld [vmem:[#allocation7 + $0x70] sm:$0xff]  ;;  %v515_v24 = vld [vmem:[#allocation7 + $0x88] sm:$0xff]  ;;  %s400_s28 = scalar_lea.vmem %s1704_s8, %s983_s15 }
  0x93   : > { %v517_v25 = vld [vmem:[#allocation7 + $0x98] sm:$0xff]  ;;  %v1005_v26 = vpack.c.bf16 %v512_v23, %v510_v22  ;;  %v514_v28 = vld [vmem:[#allocation7 + $0x80] sm:$0xff]  ;;  %v516_v29 = vld [vmem:[#allocation7 + $0x90] sm:$0xff] }
  0x94   : > { %v1007_v27 = vpack.c.bf16 %v517_v25, %v515_v24  ;;  %v519_v30 = vld [vmem:[#allocation7 + $0xa8] sm:$0xff]  ;;  %v521_v31 = vld [vmem:[#allocation7 + $0xb8] sm:$0xff]  ;;  %v1009_v32 = vpack.c.bf16 %v516_v29, %v514_v28  ;;  %v518_v34 = vld [vmem:[#allocation7 + $0xa0] sm:$0xff] }
  0x95   : > { %998 = vmatpush1.bf16.msra.mxu0 %v997_v14  ;;  %v1011_v33 = vpack.c.bf16 %v521_v31, %v519_v30  ;;  %v520_v35 = vld [vmem:[#allocation7 + $0xb0] sm:$0xff]  ;;  %v523_v36 = vld [vmem:[#allocation7 + $0xc8] sm:$0xff]  ;;  %v525_v37 = vld [vmem:[#allocation7 + $0xd8] sm:$0xff] }
  0x96   : > { %1000 = vmatprep.subr.bf16.mxu0 %v999_v15  ;;  %v1013_v38 = vpack.c.bf16 %v520_v35, %v518_v34  ;;  %v522_v39 = vld [vmem:[#allocation7 + $0xc0] sm:$0xff]  ;;  %v1015_v40 = vpack.c.bf16 %v525_v37, %v523_v36  ;;  %v524_v41 = vld [vmem:[#allocation7 + $0xd0] sm:$0xff]  ;;  %v451_v43 = vld [vmem:[%s1612_s14 + $0x8] sm:$0xff] }
  0x97   : > { %v450_v42 = vld [vmem:[%s1612_s14] sm:$0xff]  ;;  %v527_v44 = vld [vmem:[#allocation7 + $0xe8] sm:$0xff]  ;;  %v529_v45 = vld [vmem:[#allocation7 + $0xf8] sm:$0xff]  ;;  %v1017_v47 = vpack.c.bf16 %v524_v41, %v522_v39  ;;  %v470_v51 = vrot.slane %v451_v43, 4 }
  0x98   : > { %v460_v46 = vrot.slane %v450_v42, 4  ;;  %v526_v48 = vld [vmem:[#allocation7 + $0xe0] sm:$0xff]  ;;  %v528_v49 = vld [vmem:[#allocation7 + $0xf0] sm:$0xff]  ;;  %v1019_v52 = vpack.c.bf16 %v529_v45, %v527_v44  ;;  %v531_v53 = vld [vmem:[#allocation7 + $0x108] sm:$0xff] }
  0x99   : > { %1002 = vmatpush1.bf16.msra.mxu0 %v1001_v20  ;;  %v533_v54 = vld [vmem:[#allocation7 + $0x118] sm:$0xff]  ;;  %v452_v55 = vld [vmem:[%s1612_s14 + $0x10] sm:$0xff]  ;;  %v530_v56 = vld [vmem:[#allocation7 + $0x100] sm:$0xff]  ;;  %v1021_v61 = vpack.c.bf16 %v528_v49, %v526_v48 }
  0x9a   : > { %1004 = vmatprep.subr.bf16.mxu0 %v1003_v21  ;;  %v464_v50 = vmax.bf16 %v460_v46, %v450_v42  ;;  %v532_v57 = vld [vmem:[#allocation7 + $0x110] sm:$0xff]  ;;  %v402_v59 = vld [vmem:[%s1605_s18] sm:$0xff]  ;;  %v656_v60 = vld [vmem:[#allocation8 + $0x8] sm:$0xff]  ;;  %v480_v4 = vrot.slane %v452_v55, 4  ;;  %v1023_v10 = vpack.c.bf16 %v533_v54, %v531_v53 }
  0x9b   : > { %v453_v62 = vld [vmem:[%s1612_s14 + $0x18] sm:$0xff]  ;;  %v454_v63 = vld [vmem:[%s1612_s14 + $0x20] sm:$0xff]  ;;  %v657_v2 = vld [vmem:[#allocation8 + $0x10] sm:$0xff]  ;;  %v1025_v18 = vpack.c.bf16 %v532_v57, %v530_v56  ;;  %v412_v19 = vrot.slane %v402_v59, 4 }
  0x9c   : > { %v466_v58 = vmax.bf16 %v464_v50, %v451_v43  ;;  %v658_v0 = vld [vmem:[#allocation8 + $0x18] sm:$0xff]  ;;  %v655_v1 = vld [vmem:[#allocation8] sm:$0xff]  ;;  %v660_v7 = vld [vmem:[#allocation8 + $0x28] sm:$0xff]  ;;  %v490_v22 = vrot.slane %v453_v62, 4  ;;  %v461_v23 = vrot.slane %v454_v63, 4 }
  0x9d   : > { %1006 = vmatpush1.bf16.msra.mxu0 %v1005_v26  ;;  %v1055_v5 = vpack.c.bf16 %v658_v0, %v656_v60  ;;  %v1057_v6 = vpack.c.bf16 %v657_v2, %v655_v1  ;;  %v662_v8 = vld [vmem:[#allocation8 + $0x38] sm:$0xff]  ;;  %v659_v9 = vld [vmem:[#allocation8 + $0x20] sm:$0xff]  ;;  %v661_v12 = vld [vmem:[#allocation8 + $0x30] sm:$0xff] }
  0x9e   : > { %1008 = vmatprep.subr.bf16.mxu0 %v1007_v27  ;;  %v474_v3 = vmax.bf16 %v470_v51, %v466_v58  ;;  %v1059_v11 = vpack.c.bf16 %v662_v8, %v660_v7  ;;  %v664_v13 = vld [vmem:[#allocation8 + $0x48] sm:$0xff]  ;;  %v666_v14 = vld [vmem:[#allocation8 + $0x58] sm:$0xff]  ;;  %v1061_v20 = vpack.c.bf16 %v661_v12, %v659_v9  ;;  %v406_v24 = vld [vmem:[%s1605_s18 + $0x20] sm:$0xff]  ;;  %v465_v44 = vmax.bf16 %v461_v23, %v454_v63 }
  0x9f   : > { %v535_v15 = vld [vmem:[#allocation7 + $0x128] sm:$0xff]  ;;  %v537_v16 = vld [vmem:[#allocation7 + $0x138] sm:$0xff]  ;;  %1056 = vmatprep.subr.bf16.mxu1 %v1055_v5  ;;  %v1063_v25 = vpack.c.bf16 %v666_v14, %v664_v13  ;;  %v663_v26 = vld [vmem:[#allocation8 + $0x40] sm:$0xff]  ;;  %v413_v39 = vrot.slane %v406_v24, 4 }
  0xa0   : > { %v476_v17 = vmax.bf16 %v474_v3, %v452_v55  ;;  %1058 = vmatpush1.bf16.msra.mxu1 %v1057_v6  ;;  %v665_v27 = vld [vmem:[#allocation8 + $0x50] sm:$0xff]  ;;  %v1027_v28 = vpack.c.bf16 %v537_v16, %v535_v15  ;;  %v534_v29 = vld [vmem:[#allocation7 + $0x120] sm:$0xff]  ;;  %v539_v31 = vld [vmem:[#allocation7 + $0x148] sm:$0xff] }
  0xa1   : > { %1010 = vmatpush1.bf16.msra.mxu0 %v1009_v32  ;;  %1060 = vmatprep.subr.bf16.mxu1 %v1059_v11  ;;  %v536_v30 = vld [vmem:[#allocation7 + $0x130] sm:$0xff]  ;;  %v541_v32 = vld [vmem:[#allocation7 + $0x158] sm:$0xff]  ;;  %v668_v34 = vld [vmem:[#allocation8 + $0x68] sm:$0xff]  ;;  %v417_v58 = vmax.bf16 %v413_v39, %v406_v24 }
  0xa2   : > { %1012 = vmatprep.subr.bf16.mxu0 %v1011_v33  ;;  %v484_v21 = vmax.bf16 %v480_v4, %v476_v17  ;;  %v670_v35 = vld [vmem:[#allocation8 + $0x78] sm:$0xff]  ;;  %v538_v36 = vld [vmem:[#allocation7 + $0x140] sm:$0xff]  ;;  %v540_v37 = vld [vmem:[#allocation7 + $0x150] sm:$0xff]  ;;  %v1029_v41 = vpack.c.bf16 %v536_v30, %v534_v29 }
  0xa3   : > { %v403_v43 = vld [vmem:[%s1605_s18 + $0x8] sm:$0xff]  ;;  %v667_v45 = vld [vmem:[#allocation8 + $0x60] sm:$0xff]  ;;  %v669_v46 = vld [vmem:[#allocation8 + $0x70] sm:$0xff]  ;;  %v1067_v49 = vpack.c.bf16 %v670_v35, %v668_v34  ;;  %v1033_v60 = vpack.c.bf16 %v540_v37, %v538_v36 }
  0xa4   : > { %v486_v33 = vmax.bf16 %v484_v21, %v453_v62  ;;  %1062 = vmatpush1.bf16.msra.mxu1 %v1061_v20  ;;  %v455_v48 = vld [vmem:[%s1612_s14 + $0x28] sm:$0xff]  ;;  %v674_v51 = vld [vmem:[#allocation8 + $0x98] sm:$0xff]  ;;  %v542_v55 = vld [vmem:[#allocation7 + $0x160] sm:$0xff]  ;;  %v422_v57 = vrot.slane %v403_v43, 4 }
  0xa5   : > { %1014 = vmatpush1.bf16.msra.mxu0 %v1013_v38  ;;  %v416_v38 = vmax.bf16 %v412_v19, %v402_v59  ;;  %1064 = vmatprep.subr.bf16.mxu1 %v1063_v25  ;;  %v672_v50 = vld [vmem:[#allocation8 + $0x88] sm:$0xff]  ;;  %v545_v53 = vld [vmem:[#allocation7 + $0x178] sm:$0xff]  ;;  %v1069_v59 = vpack.c.bf16 %v669_v46, %v667_v45  ;;  %v471_v62 = vrot.slane %v455_v48, 4  ;;  %v671_v1 = vld [vmem:[#allocation8 + $0x80] sm:$0xff] }
  0xa6   : > { %1016 = vmatprep.subr.bf16.mxu0 %v1015_v40  ;;  %v1065_v40 = vpack.c.bf16 %v665_v27, %v663_v26  ;;  %v1633_v42 = vmax.bf16 %v490_v22, %v486_v33  ;;  %v407_v63 = vld [vmem:[%s1605_s18 + $0x28] sm:$0xff]  ;;  %v1071_v0 = vpack.c.bf16 %v674_v51, %v672_v50  ;;  %v673_v2 = vld [vmem:[#allocation8 + $0x90] sm:$0xff]  ;;  %v678_v6 = vld [vmem:[#allocation8 + $0xb8] sm:$0xff] }
  0xa7   : > { %v418_v56 = vmax.bf16 %v416_v38, %v403_v43  ;;  %v544_v4 = vld [vmem:[#allocation7 + $0x170] sm:$0xff]  ;;  %v676_v5 = vld [vmem:[#allocation8 + $0xa8] sm:$0xff]  ;;  %v549_v8 = vld [vmem:[#allocation7 + $0x198] sm:$0xff]  ;;  %v419_v12 = vmax.bf16 %v417_v58, %v407_v63  ;;  %v423_v13 = vrot.slane %v407_v63, 4  ;;  %v1073_v14 = vpack.c.bf16 %v673_v2, %v671_v1 }
  0xa8   : > { %v496_v54 = vunpack.c.l.bf16 %v1633_v42  ;;  %1066 = vmatpush1.bf16.msra.mxu1 %v1065_v40  ;;  %v547_v7 = vld [vmem:[#allocation7 + $0x188] sm:$0xff]  ;;  %v546_v9 = vld [vmem:[#allocation7 + $0x180] sm:$0xff]  ;;  %v1037_v15 = vpack.c.bf16 %v544_v4, %v542_v55  ;;  %v404_v16 = vld [vmem:[%s1605_s18 + $0x10] sm:$0xff] }
  0xa9   : > { %1018 = vmatpush1.bf16.msra.mxu0 %v1017_v47  ;;  %v1031_v47 = vpack.c.bf16 %v541_v32, %v539_v31  ;;  %1068 = vmatprep.subr.bf16.mxu1 %v1067_v49  ;;  %v426_v11 = vmax.bf16 %v422_v57, %v418_v56  ;;  %v675_v19 = vld [vmem:[#allocation8 + $0xa0] sm:$0xff]  ;;  %v677_v20 = vld [vmem:[#allocation8 + $0xb0] sm:$0xff]  ;;  %v1039_v21 = vpack.c.bf16 %v549_v8, %v547_v7  ;;  %v680_v23 = vld [vmem:[#allocation8 + $0xc8] sm:$0xff]  ;;  %v432_v29 = vrot.slane %v404_v16, 4 }
  0xaa   : > { %1020 = vmatprep.subr.bf16.mxu0 %v1019_v52  ;;  %v543_v52 = vld [vmem:[#allocation7 + $0x168] sm:$0xff]  ;;  %638 = vmatprep.mubr.f32.mxu0 %v496_v54  ;;  %v456_v22 = vld [vmem:[%s1612_s14 + $0x30] sm:$0xff]  ;;  %v682_v24 = vld [vmem:[#allocation8 + $0xd8] sm:$0xff]  ;;  %v427_v30 = vmax.bf16 %v423_v13, %v419_v12  ;;  %v1077_v31 = vpack.c.bf16 %v677_v20, %v675_v19 }
  0xab   : > { %v1035_v3 = vpack.c.bf16 %v545_v53, %v543_v52  ;;  %v551_v25 = vld [vmem:[#allocation7 + $0x1a8] sm:$0xff]  ;;  %v553_v26 = vld [vmem:[#allocation7 + $0x1b8] sm:$0xff]  ;;  %v550_v27 = vld [vmem:[#allocation7 + $0x1a0] sm:$0xff]  ;;  %v481_v34 = vrot.slane %v456_v22, 4  ;;  %v1079_v36 = vpack.c.bf16 %v682_v24, %v680_v23 }
  0xac   : > { %1070 = vmatpush1.bf16.msra.mxu1 %v1069_v59  ;;  %v408_v35 = vld [vmem:[%s1605_s18 + $0x30] sm:$0xff]  ;;  %v679_v37 = vld [vmem:[#allocation8 + $0xc0] sm:$0xff]  ;;  %v1043_v39 = vpack.c.bf16 %v553_v26, %v551_v25  ;;  %v686_v43 = vld [vmem:[#allocation8 + $0xf8] sm:$0xff] }
  0xad   : > { %1022 = vmatpush1.bf16.msra.mxu0 %v1021_v61  ;;  %v467_v61 = vmax.bf16 %v465_v44, %v455_v48  ;;  %1072 = vmatprep.subr.bf16.mxu1 %v1071_v0  ;;  %v681_v38 = vld [vmem:[#allocation8 + $0xd0] sm:$0xff]  ;;  %v555_v44 = vld [vmem:[#allocation7 + $0x1c8] sm:$0xff]  ;;  %v557_v45 = vld [vmem:[#allocation7 + $0x1d8] sm:$0xff]  ;;  %v429_v49 = vmax.bf16 %v427_v30, %v408_v35  ;;  %v433_v50 = vrot.slane %v408_v35, 4 }
  0xae   : > { %1024 = vmatprep.subr.bf16.mxu0 %v1023_v10  ;;  %v548_v10 = vld [vmem:[#allocation7 + $0x190] sm:$0xff]  ;;  %v554_v46 = vld [vmem:[#allocation7 + $0x1c0] sm:$0xff]  ;;  %v1081_v51 = vpack.c.bf16 %v681_v38, %v679_v37  ;;  %v405_v53 = vld [vmem:[%s1605_s18 + $0x18] sm:$0xff]  ;;  %v1047_v59 = vpack.c.bf16 %v557_v45, %v555_v44 }
  0xaf   : > { %v475_v17 = vmax.bf16 %v471_v62, %v467_v61  ;;  %v1041_v32 = vpack.c.bf16 %v548_v10, %v546_v9  ;;  %v552_v40 = vld [vmem:[#allocation7 + $0x1b0] sm:$0xff]  ;;  %v683_v57 = vld [vmem:[#allocation8 + $0xe0] sm:$0xff]  ;;  %v688_v61 = vld [vmem:[#allocation8 + $0x108] sm:$0xff]  ;;  %v437_v4 = vmax.bf16 %v433_v50, %v429_v49 }
  0xb0   : > { %1074 = vmatpush1.bf16.msra.mxu1 %v1073_v14  ;;  %v1045_v52 = vpack.c.bf16 %v552_v40, %v550_v27  ;;  %v685_v58 = vld [vmem:[#allocation8 + $0xf0] sm:$0xff]  ;;  %v690_v62 = vld [vmem:[#allocation8 + $0x118] sm:$0xff]  ;;  %v559_v63 = vld [vmem:[#allocation7 + $0x1e8] sm:$0xff] }
  0xb1   : > { %1026 = vmatpush1.bf16.msra.mxu0 %v1025_v18  ;;  %v1075_v18 = vpack.c.bf16 %v678_v6, %v676_v5  ;;  %v477_v33 = vmax.bf16 %v475_v17, %v456_v22  ;;  %v561_v0 = vld [vmem:[#allocation7 + $0x1f8] sm:$0xff]  ;;  %v558_v1 = vld [vmem:[#allocation7 + $0x1e0] sm:$0xff]  ;;  %v1085_v5 = vpack.c.bf16 %v685_v58, %v683_v57  ;;  %v1087_v10 = vpack.c.bf16 %v690_v62, %v688_v61  ;;  %v689_v12 = vld [vmem:[#allocation8 + $0x110] sm:$0xff] }
  0xb2   : > { %1028 = vmatprep.subr.bf16.mxu0 %v1027_v28  ;;  %v428_v28 = vmax.bf16 %v426_v11, %v404_v16  ;;  %v409_v9 = vld [vmem:[%s1605_s18 + $0x38] sm:$0xff]  ;;  %v687_v11 = vld [vmem:[#allocation8 + $0x100] sm:$0xff]  ;;  %v1051_v13 = vpack.c.bf16 %v561_v0, %v559_v63  ;;  %v560_v14 = vld [vmem:[#allocation7 + $0x1f0] sm:$0xff] }
  0xb3   : > { %1076 = vmatprep.subr.bf16.mxu1 %v1075_v18  ;;  %v485_v55 = vmax.bf16 %v481_v34, %v477_v33  ;;  %v694_v16 = vld [vmem:[#allocation8 + $0x138] sm:$0xff]  ;;  %v439_v18 = vmax.bf16 %v437_v4, %v409_v9  ;;  %v443_v19 = vrot.slane %v409_v9, 4  ;;  %v1089_v20 = vpack.c.bf16 %v689_v12, %v687_v11  ;;  %v691_v24 = vld [vmem:[#allocation8 + $0x120] sm:$0xff]  ;;  %v693_v25 = vld [vmem:[#allocation8 + $0x130] sm:$0xff] }
  0xb4   : > { %v436_v48 = vmax.bf16 %v432_v29, %v428_v28  ;;  %1078 = vmatpush1.bf16.msra.mxu1 %v1077_v31  ;;  %v696_v26 = vld [vmem:[#allocation8 + $0x148] sm:$0xff]  ;;  %v698_v27 = vld [vmem:[#allocation8 + $0x158] sm:$0xff]  ;;  %v1093_v30 = vpack.c.bf16 %v693_v25, %v691_v24  ;;  %v695_v33 = vld [vmem:[#allocation8 + $0x140] sm:$0xff] }
  0xb5   : > { %1030 = vmatpush1.bf16.msra.mxu0 %v1029_v41  ;;  %v684_v41 = vld [vmem:[#allocation8 + $0xe8] sm:$0xff]  ;;  %1080 = vmatprep.subr.bf16.mxu1 %v1079_v36  ;;  %v1652_v29 = vmax.bf16 %v443_v19, %v439_v18  ;;  %v697_v34 = vld [vmem:[#allocation8 + $0x150] sm:$0xff]  ;;  %v702_v36 = vld [vmem:[#allocation8 + $0x178] sm:$0xff] }
  0xb6   : > { %1032 = vmatprep.subr.bf16.mxu0 %v1031_v47  ;;  %v556_v47 = vld [vmem:[#allocation7 + $0x1d0] sm:$0xff]  ;;  %v1083_v56 = vpack.c.bf16 %v686_v43, %v684_v41  ;;  %v438_v2 = vmax.bf16 %v436_v48, %v405_v53  ;;  %v700_v35 = vld [vmem:[#allocation8 + $0x168] sm:$0xff]  ;;  %v1097_v38 = vpack.c.bf16 %v697_v34, %v695_v33  ;;  %v699_v40 = vld [vmem:[#allocation8 + $0x160] sm:$0xff] }
  0xb7   : > { %v1049_v6 = vpack.c.bf16 %v556_v47, %v554_v46  ;;  %v449_v37 = vunpack.c.l.bf16 %v1652_v29  ;;  %v701_v41 = vld [vmem:[#allocation8 + $0x170] sm:$0xff]  ;;  %v704_v43 = vld [vmem:[#allocation8 + $0x188] sm:$0xff]  ;;  %v706_v44 = vld [vmem:[#allocation8 + $0x198] sm:$0xff] }
  0xb8   : > { %1082 = vmatpush1.bf16.msra.mxu1 %v1081_v51  ;;  %v1101_v45 = vpack.c.bf16 %v701_v41, %v699_v40  ;;  %v1103_v46 = vpack.c.bf16 %v706_v44, %v704_v43  ;;  %v703_v47 = vld [vmem:[#allocation8 + $0x180] sm:$0xff]  ;;  %v705_v48 = vld [vmem:[#allocation8 + $0x190] sm:$0xff]  ;;  %v708_v49 = vld [vmem:[#allocation8 + $0x1a8] sm:$0xff] }
  0xb9   : > { %1034 = vmatpush1.bf16.msra.mxu0 %v1033_v60  ;;  %v457_v60 = vld [vmem:[%s1612_s14 + $0x38] sm:$0xff]  ;;  %1084 = vmatprep.subr.bf16.mxu1 %v1083_v56  ;;  %v1105_v51 = vpack.c.bf16 %v705_v48, %v703_v47  ;;  %v712_v56 = vld [vmem:[#allocation8 + $0x1c8] sm:$0xff]  ;;  %v713_v61 = vld [vmem:[#allocation8 + $0x1d0] sm:$0xff] }
  0xba   : > { %1036 = vmatprep.subr.bf16.mxu0 %v1035_v3  ;;  %v442_v3 = vrot.slane %v405_v53, 4  ;;  %v487_v7 = vmax.bf16 %v485_v55, %v457_v60  ;;  %v491_v8 = vrot.slane %v457_v60, 4  ;;  %v710_v50 = vld [vmem:[#allocation8 + $0x1b8] sm:$0xff]  ;;  %v707_v53 = vld [vmem:[#allocation8 + $0x1a0] sm:$0xff]  ;;  %v709_v55 = vld [vmem:[#allocation8 + $0x1b0] sm:$0xff] }
  0xbb   : > { %v714_v57 = vld [vmem:[#allocation8 + $0x1d8] sm:$0xff]  ;;  %v1109_v58 = vpack.c.bf16 %v709_v55, %v707_v53  ;;  %v711_v60 = vld [vmem:[#allocation8 + $0x1c0] sm:$0xff]  ;;  %v716_v63 = vld [vmem:[#allocation8 + $0x1e8] sm:$0xff] }
  0xbc   : > { %v1647_v17 = vmax.bf16 %v442_v3, %v438_v2  ;;  %1086 = vmatpush1.bf16.msra.mxu1 %v1085_v5  ;;  %v1649_v22 = vmax.bf16 %v491_v8, %v487_v7  ;;  %v1113_v62 = vpack.c.bf16 %v713_v61, %v711_v60  ;;  %v718_v0 = vld [vmem:[#allocation8 + $0x1f8] sm:$0xff]  ;;  %v715_v2 = vld [vmem:[#allocation8 + $0x1e0] sm:$0xff]  ;;  %v717_v3 = vld [vmem:[#allocation8 + $0x1f0] sm:$0xff]  ;;  %v564_v5 = vlaneseq }
  0xbd   : > { %1038 = vmatpush1.bf16.msra.mxu0 %v1037_v15  ;;  %v692_v15 = vld [vmem:[#allocation8 + $0x128] sm:$0xff]  ;;  %1088 = vmatprep.subr.bf16.mxu1 %v1087_v10  ;;  %v1117_v4 = vpack.c.bf16 %v717_v3, %v715_v2  ;;  %v562_v8 = vld [vmem:[%s1699_s3] sm:$0x3] }
  0xbe   : > { %1040 = vmatprep.subr.bf16.mxu0 %v1039_v21  ;;  %v1053_v21 = vpack.c.bf16 %v560_v14, %v558_v1  ;;  %v1091_v23 = vpack.c.bf16 %v694_v16, %v692_v15  ;;  %v448_v28 = vunpack.c.l.bf16 %v1647_v17  ;;  %v497_v31 = vunpack.c.l.bf16 %v1649_v22  ;;  %v820_v33 = vld [vmem:[%s1702_s6] sm:$0x3] }
  0xbf   : > { %v1115_v1 = vpack.c.bf16 %v718_v0, %v716_v63  ;;  %v984_v29 = vld [vmem:[#allocation2] ss:$0 sm:$0xff] }
  0xc0   : > { %1090 = vmatpush1.bf16.msra.mxu1 %v1089_v20 }
  0xc1   : > { %1042 = vmatpush1.bf16.msra.mxu0 %v1041_v32  ;;  %1092 = vmatprep.subr.bf16.mxu1 %v1091_v23  ;;  %v1095_v32 = vpack.c.bf16 %v698_v27, %v696_v26  ;;  %v800_v26 = vld [vmem:[%s1701_s5] sm:$0x3] }
  0xc2   : > { %1044 = vmatprep.subr.bf16.mxu0 %v1043_v39  ;;  %v1099_v39 = vpack.c.bf16 %v702_v36, %v700_v35 }
  0xc4   : > { %1094 = vmatpush1.bf16.msra.mxu1 %v1093_v30 }
  0xc5   : > { %1046 = vmatpush1.bf16.msra.mxu0 %v1045_v52  ;;  %1096 = vmatprep.subr.bf16.mxu1 %v1095_v32  ;;  %v1107_v52 = vpack.c.bf16 %v710_v50, %v708_v49 }
  0xc6   : > { %1048 = vmatprep.subr.bf16.mxu0 %v1047_v59  ;;  %v1111_v59 = vpack.c.bf16 %v714_v57, %v712_v56 }
  0xc8   : > { %1098 = vmatpush1.bf16.msra.mxu1 %v1097_v38 }
  0xc9   : > { %1050 = vmatpush1.bf16.msra.mxu0 %v1049_v6  ;;  %1100 = vmatprep.subr.bf16.mxu1 %v1099_v39  ;;  %v565_v6 = vshrl.u32 %v564_v5, 7 }
  0xca   : > { %1052 = vmatprep.subr.bf16.mxu0 %v1051_v13 }
  0xcb   : > { %v566_v7 = vsub.s32 0, %v565_v6  ;;  %v570_v9 = vsub.s32 1, %v565_v6 }
  0xcc   : > { %1102 = vmatpush1.bf16.msra.mxu1 %v1101_v45 }
  0xcd   : > { %1054 = vmatpush1.bf16.msra.mxu0 %v1053_v21  ;;  %1104 = vmatprep.subr.bf16.mxu1 %v1103_v46  ;;  %v567_v10 = vrot.slane %v562_v8, %v566_v7  ;;  %v571_v11 = vrot.slane %v562_v8, %v570_v9  ;;  %v805_v27 = vrot.slane %v800_v26, %v566_v7 }
  0xce   : > { %v809_v32 = vrot.slane %v800_v26, %v570_v9  ;;  %v825_v39 = vrot.slane %v820_v33, %v566_v7  ;;  %v829_v43 = vrot.slane %v820_v33, %v570_v9 }
  0xd0   : > { %639 = vmatmul.mubr.f32.vlgmr.msra.gmra.mrb[0].mxu0 %v448_v28  ;;  %1106 = vmatpush1.bf16.msra.mxu1 %v1105_v51 }
  0xd1   : > { %644 = vmatprep.mubr.f32.mxu0 %v497_v31  ;;  %1108 = vmatprep.subr.bf16.mxu1 %v1107_v52 }
  0xd4   : > { %645 = vmatmul.mubr.f32.gmra.mrb[2].mxu0 %v449_v37  ;;  %1110 = vmatpush1.bf16.msra.mxu1 %v1109_v58 }
  0xd5   : > { %1112 = vmatprep.subr.bf16.mxu1 %v1111_v59 }
  0xd8   : > { %1114 = vmatpush1.bf16.msra.mxu1 %v1113_v62 }
  0xd9   : > { %1116 = vmatprep.subr.bf16.mxu1 %v1115_v1 }
  0xdc   : > { %1118 = vmatpush1.bf16.msra.mxu1 %v1117_v4 }
 0x1a3   : > { %v640_v12 = vpop.f32.mrb[0].mxu0 }
 0x1a4   : > { %v641_v13 = vadd.f32 %v640_v12, %v567_v10  ;;  %v642_v14 = vpop.f32.mrb[1].mxu0 }
 0x1a5   : > { %v643_v15 = vadd.f32 %v642_v14, %v571_v11 }
 0x1a6   : > { %v651_v19 = vmax.f32 %v641_v13, 0.0 }
 0x1a7   : > { %v646_v16 = vpop.f32.mrb[2].mxu0  ;;  %v652_v18 = vmax.f32 %v643_v15, 0.0 }
 0x1a8   : > { %v647_v20 = vadd.f32 %v646_v16, %v567_v10  ;;  %v648_v21 = vpop.f32.mrb[3].mxu0 }
 0x1a9   : > { %v649_v23 = vadd.f32 %v648_v21, %v571_v11  ;;  %783 = vmatprep.mubr.f32.mxu1 %v652_v18 }
 0x1aa   : > { %784 = vmatmul.mubr.f32.vlgmr.msra.gmra.mrb[0].mxu1 %v651_v19  ;;  %v653_v25 = vmax.f32 %v647_v20, 0.0 }
 0x1ab   : > { %v654_v24 = vmax.f32 %v649_v23, 0.0 }
 0x1ad   : > { %789 = vmatprep.mubr.f32.mxu1 %v654_v24 }
 0x1ae   : > { %790 = vmatmul.mubr.f32.gmra.mrb[2].mxu1 %v653_v25 }
 0x27d   : > { %v785_v30 = vpop.f32.mrb[0].mxu1 }
 0x27e   : > { %v796_v34 = vadd.f32 %v785_v30, %v448_v28  ;;  %v787_v35 = vpop.f32.mrb[1].mxu1 }
 0x27f   : > { %v797_v36 = vadd.f32 %v787_v35, %v496_v54 }
 0x280   : > { %v812_v38 = vadd.f32 %v805_v27, %v796_v34 }
 0x281   : > { %v813_v40 = vadd.f32 %v809_v32, %v797_v36  ;;  %v791_v41 = vpop.f32.mrb[2].mxu1 }
 0x282   : > { %v816_v44 = vmax.f32 %v812_v38, 0.0  ;;  %v798_v45 = vadd.f32 %v791_v41, %v449_v37  ;;  %v793_v46 = vpop.f32.mrb[3].mxu1 }
 0x283   : > { %v817_v47 = vmax.f32 %v813_v40, 0.0  ;;  %v799_v17 = vadd.f32 %v793_v46, %v497_v31 }
 0x284   : > { %v814_v28 = vadd.f32 %v805_v27, %v798_v45  ;;  %v832_v48 = vmul.f32 %v825_v39, %v816_v44 }
 0x285   : > { %v815_v49 = vadd.f32 %v809_v32, %v799_v17  ;;  %v833_v42 = vmul.f32 %v829_v43, %v817_v47 }
 0x286   : > { %v818_v54 = vmax.f32 %v814_v28, 0.0 }
 0x287   : > { %v819_v50 = vmax.f32 %v815_v49, 0.0  ;;  %v836_v51 = vadd.f32 %v833_v42, %v832_v48 }
 0x288   : > { %v834_v52 = vmul.f32 %v825_v39, %v818_v54 }
 0x289   : > { %837 = vadd.xlane.f32.xlu0 %v836_v51  ;;  %v835_v53 = vmul.f32 %v829_v43, %v819_v50 }
 0x28b   : > { %v839_v55 = vadd.f32 %v835_v53, %v834_v52 }
 0x28d   : > { %840 = vadd.xlane.f32.xlu0 %v839_v55 }
 0x316   : > { %v838_v22 = vpop.xlane.xlu0 %837 }
 0x317   : > { %v849_v31 = vadd.f32 %v984_v29, %v838_v22 }
 0x319   : > { %852 = vst.msk [vmem:[%s400_s28] sm:$0xff] %vm851_vm0, %v849_v31 }
 0x31a   : > { %v841_v37 = vpop.xlane.xlu0 %840 }
 0x31b   : > { %v850_v56 = vadd.f32 %v984_v29, %v841_v37 }
 0x31d   : > { %853 = vst.msk [vmem:[%s400_s28 + $0x8] sm:$0xff] %vm851_vm0, %v850_v56 }
 0x31e PF: > { %p24_p12 = scmp.ge.s32.totalorder %s1501_s25, 6   ;;  %s1720_s29 = smov %s1342_s30 }
 0x31f   : > { %s1721_s30 = smov %s1346_s9  ;;  %s1722_s9 = smov %s1512_s13 }
 0x320   : > { %s1723_s10 = smov %s1501_s25  ;;  %26 = sbr.rel (!%p24_p12) target bundleno = 9 (0x9), region = 113 }
 0x327   :  { %876 = vsyncpa [#allocation4], 1 }
 0x328   :  { %878 = vsyncpa [#allocation4 + $0x1], 1 }
 0x329   :  { %879 = vsyncpa [#allocation6], 1 }
 0x32a   :  { %881 = vsyncpa [#allocation6 + $0x1], 1 }
 0x32b   :  { %882 = vsyncpa [#allocation9], 1 }

</bundles_post_ra>
